<compile_context>
chip_gen: v5e
topology: v5e:2x2
jax: 0.10.0
libtpu: 0.0.40
codegen_flags: <defaults>
</compile_context>

<pallas_src>
import functools

import jax
import jax.numpy as jnp
from jax import lax
from jax.experimental import pallas as pl
from jax.experimental.pallas import tpu as pltpu


def _max_variance_kernel(hw, tile_hw, needs_mask, x_ref, o_ref, acc_ref):
    j = pl.program_id(1)

    @pl.when(j == 0)
    def _():
        acc_ref[...] = jnp.zeros_like(acc_ref)

    x = x_ref[...].astype(jnp.float32)                    # (1, C, tile_hw)
    mean = jnp.mean(x, axis=1, keepdims=True)             # (1, 1, tile_hw)
    diff = x - mean
    var = jnp.mean(diff * diff, axis=1, keepdims=True)    # (1, 1, tile_hw)

    if needs_mask:
        # Zero the out-of-bounds spatial columns of the ragged last block
        # (padded reads may contain garbage -> their var must not be summed).
        # For all earlier blocks the predicate is uniformly true (cheap no-op
        # select on a single (1,1,tile_hw) slab).
        col = j * tile_hw + lax.broadcasted_iota(jnp.int32, (1, 1, tile_hw), 2)
        var = jnp.where(col < hw, var, 0.0)

    acc_ref[...] += var                                    # per-lane partial sums

    @pl.when(j == pl.num_programs(1) - 1)
    def _():
        # Single cross-lane reduction per batch element, once at the end.
        o_ref[...] = jnp.sum(acc_ref[...], axis=2, keepdims=True)


def max_variance_loss(x, dim=1, target_block_bytes=4 * 1024 * 1024):
    """x: (N, C, *spatial) array (NCHW-like, as in the PyTorch module).

    Returns the scalar loss -mean(var_over_channels(x)).
    """
    # TODO(synk): generic `dim` would need a wrapper moveaxis; module default is dim=1.
    assert dim == 1, "kernel implemented for the default dim=1 (channel axis)"
    assert x.ndim >= 2, "expect (N, C, ...) input"
    n, c = x.shape[0], x.shape[1]
    hw = 1
    for s in x.shape[2:]:
        hw *= s
    x3d = x.reshape(n, c, hw)          # free reshape: no transpose, no HBM copy

    # Spatial tile: multiple of 128 lanes, ~target_block_bytes per input block,
    # never exceeding the (lane-padded) spatial extent.
    bytes_per_col = c * x.dtype.itemsize
    tile_hw = max(128, (target_block_bytes // max(bytes_per_col, 1)) // 128 * 128)
    tile_hw = min(tile_hw, pl.cdiv(hw, 128) * 128)
    num_j = pl.cdiv(hw, tile_hw)
    needs_mask = (hw % tile_hw) != 0

    kernel = functools.partial(_max_variance_kernel, hw, tile_hw, needs_mask)

    # Conservative VMEM budget: double-buffered input block + scratch + slack,
    # capped at 32 MiB (safe on v5e/v6e/v7x physical limits).
    block_bytes = c * tile_hw * x.dtype.itemsize
    vmem_bytes = min(32 * 1024 * 1024,
                     max(8 * 1024 * 1024, 2 * block_bytes + 4 * tile_hw + (2 << 20)))

    partial_sums = pl.pallas_call(
        kernel,
        out_shape=jax.ShapeDtypeStruct((n, 1, 1), jnp.float32),
        grid=(n, num_j),
        in_specs=[pl.BlockSpec((1, c, tile_hw), lambda i, j: (i, 0, j))],
        out_specs=pl.BlockSpec((1, 1, 1), lambda i, j: (i, 0, 0)),
        scratch_shapes=[pltpu.VMEM((1, 1, tile_hw), jnp.float32)],
        compiler_params=pltpu.CompilerParams(
            dimension_semantics=("parallel", "arbitrary"),
            vmem_limit_bytes=vmem_bytes,
        ),
    )(x3d)

    # Tiny final reduction over the N per-batch partial sums.
    return -(jnp.sum(partial_sums) / jnp.float32(n * hw))


def max_variance_loss_ref(x, dim=1):
    mean = jnp.mean(x, axis=dim, keepdims=True)
    var = jnp.mean((x - mean) ** 2, axis=dim)
    return -jnp.mean(var)


if __name__ == "__main__":
    key = jax.random.PRNGKey(0)
    # Small shapes consistent with a feature map: batch=2, channels=4, spatial=16x16.
    x = jax.random.normal(key, (2, 4, 16, 16), dtype=jnp.float32)

    loss = jax.block_until_ready(max_variance_loss(x))
    ref = jax.block_until_ready(max_variance_loss_ref(x))

    assert jnp.allclose(loss, ref, rtol=1e-5, atol=1e-5), (loss, ref)
    print("KERNEL_OK")
</pallas_src>

<mosaic_0001>
module attributes {stable_mosaic.version = 11 : i64} {
  func.func @_max_variance_kernel(%arg0: i32, %arg1: i32, %arg2: memref<1x4x256xf32, #tpu.memory_space<vmem>>, %arg3: memref<1x1x1xf32, #tpu.memory_space<vmem>>, %arg4: memref<1x1x256xf32, #tpu.memory_space<vmem>>) attributes {dimension_semantics = [#tpu.dimension_semantics<parallel>, #tpu.dimension_semantics<arbitrary>], iteration_bounds = array<i64: 2, 1>, scalar_prefetch = 0 : i64, scratch_operands = 1 : i64, tpu.core_type = #tpu.core_type<tc>, window_params = [{transform_indices = @transform_0, window_bounds = array<i64: 1, 4, 256>}, {transform_indices = @transform_1, window_bounds = array<i64: 1, 1, 1>}]} {
    %c0_i32 = arith.constant 0 : i32
    %0 = arith.cmpi eq, %arg1, %c0_i32 : i32
    %1 = arith.extui %0 : i1 to i32
    %c0_i32_0 = arith.constant 0 : i32
    %2 = arith.cmpi ne, %1, %c0_i32_0 : i32
    scf.if %2 {
      %cst_14 = arith.constant 0.000000e+00 : f32
      %21 = vector.broadcast %cst_14 : f32 to vector<1x1x256xf32>
      %c0_15 = arith.constant 0 : index
      %c0_16 = arith.constant 0 : index
      %c0_17 = arith.constant 0 : index
      %22 = vector.load %arg4[%c0_15, %c0_16, %c0_17] : memref<1x1x256xf32, #tpu.memory_space<vmem>>, vector<1x1x256xf32>
      tpu.vector_store %arg4[%c0_15, %c0_16, %c0_17], %21 {strides = array<i32>} : memref<1x1x256xf32, #tpu.memory_space<vmem>>, vector<1x1x256xf32>,
    } else {
    }
    %c0 = arith.constant 0 : index
    %c0_1 = arith.constant 0 : index
    %c0_2 = arith.constant 0 : index
    %3 = vector.load %arg2[%c0, %c0_1, %c0_2] : memref<1x4x256xf32, #tpu.memory_space<vmem>>, vector<1x4x256xf32>
    %cst = arith.constant dense<0.000000e+00> : vector<1x256xf32>
    %4 = vector.multi_reduction <add>, %3, %cst [1] : vector<1x4x256xf32> to vector<1x256xf32>
    %5 = vector.shape_cast %4 : vector<1x256xf32> to vector<1x1x256xf32>
    %cst_3 = arith.constant 4.000000e+00 : f32
    %6 = vector.broadcast %cst_3 : f32 to vector<1x1x256xf32>
    %7 = arith.divf %5, %6 : vector<1x1x256xf32>
    %8 = vector.broadcast %7 : vector<1x1x256xf32> to vector<1x4x256xf32>
    %9 = arith.subf %3, %8 : vector<1x4x256xf32>
    %10 = arith.mulf %9, %9 : vector<1x4x256xf32>
    %cst_4 = arith.constant dense<0.000000e+00> : vector<1x256xf32>
    %11 = vector.multi_reduction <add>, %10, %cst_4 [1] : vector<1x4x256xf32> to vector<1x256xf32>
    %12 = vector.shape_cast %11 : vector<1x256xf32> to vector<1x1x256xf32>
    %cst_5 = arith.constant 4.000000e+00 : f32
    %13 = vector.broadcast %cst_5 : f32 to vector<1x1x256xf32>
    %14 = arith.divf %12, %13 : vector<1x1x256xf32>
    %c0_6 = arith.constant 0 : index
    %c0_7 = arith.constant 0 : index
    %c0_8 = arith.constant 0 : index
    %15 = vector.load %arg4[%c0_6, %c0_7, %c0_8] : memref<1x1x256xf32, #tpu.memory_space<vmem>>, vector<1x1x256xf32>
    %16 = arith.addf %15, %14 : vector<1x1x256xf32>
    %c0_9 = arith.constant 0 : index
    %c0_10 = arith.constant 0 : index
    %c0_11 = arith.constant 0 : index
    %17 = vector.load %arg4[%c0_9, %c0_10, %c0_11] : memref<1x1x256xf32, #tpu.memory_space<vmem>>, vector<1x1x256xf32>
    tpu.vector_store %arg4[%c0_9, %c0_10, %c0_11], %16 {strides = array<i32>} : memref<1x1x256xf32, #tpu.memory_space<vmem>>, vector<1x1x256xf32>,
    %c0_i32_12 = arith.constant 0 : i32
    %18 = arith.cmpi eq, %arg1, %c0_i32_12 : i32
    %19 = arith.extui %18 : i1 to i32
    %c0_i32_13 = arith.constant 0 : i32
    %20 = arith.cmpi ne, %19, %c0_i32_13 : i32
    scf.if %20 {
      %c0_14 = arith.constant 0 : index
      %c0_15 = arith.constant 0 : index
      %c0_16 = arith.constant 0 : index
      %21 = vector.load %arg4[%c0_14, %c0_15, %c0_16] : memref<1x1x256xf32, #tpu.memory_space<vmem>>, vector<1x1x256xf32>
      %cst_17 = arith.constant dense<0.000000e+00> : vector<1x1xf32>
      %22 = vector.multi_reduction <add>, %21, %cst_17 [2] : vector<1x1x256xf32> to vector<1x1xf32>
      %23 = vector.shape_cast %22 : vector<1x1xf32> to vector<1x1x1xf32>
      %c0_18 = arith.constant 0 : index
      %c0_19 = arith.constant 0 : index
      %c0_20 = arith.constant 0 : index
      %24 = vector.load %arg3[%c0_18, %c0_19, %c0_20] : memref<1x1x1xf32, #tpu.memory_space<vmem>>, vector<1x1x1xf32>
      tpu.vector_store %arg3[%c0_18, %c0_19, %c0_20], %23 {strides = array<i32>} : memref<1x1x1xf32, #tpu.memory_space<vmem>>, vector<1x1x1xf32>,
    } else {
    }
    return
  }
  func.func @transform_0(%arg0: i32, %arg1: i32) -> (i32, i32, i32) {
    %c0_i32 = arith.constant 0 : i32
    %c0_i32_0 = arith.constant 0 : i32
    return %arg0, %c0_i32, %arg1 : i32, i32, i32
  }
  func.func @transform_1(%arg0: i32, %arg1: i32) -> (i32, i32, i32) {
    %c0_i32 = arith.constant 0 : i32
    %c0_i32_0 = arith.constant 0 : i32
    %c0_i32_1 = arith.constant 0 : i32
    return %arg0, %c0_i32, %c0_i32_0 : i32, i32, i32
  }
}

</mosaic_0001>

<bundles_post_ra>
// kernel: tpu_custom_call.1
= control target key start
LH: loop header
LB: loop body
LE: loop exit
PB: predicated region body
PF: predicated region fallthrough
CT: control target
= control target key end

     0   :  { %6 = vsyncpa [#allocation4], 0  ;;  %s584_s0 = inlined_call_operand.hbm [shape: f32[2,4,256], index: 0, kind: input, shape index: {}]   ;;  %s585_s1 = inlined_call_operand.vmem [shape: f32[2,1,1], index: 1, kind: output, shape index: {}]  }
   0x1   :  { %8 = vsyncpa [#allocation4 + $0x1], 0  ;;  %s483_s6 = smov 0   ;;  %s485_s7 = smov 0  }
   0x2   :  { %s487_s8 = smov 0   ;;  %s489_s9 = smov 0  }
   0x3   :  { %s491_s10 = smov 0   ;;  %s493_s11 = smov 0  }
   0x4 LB: > { %s318_s12 = sadd.s32 4294967295, %s469_s11   ;;  %s26_s13 = sadd.s32 1, %s465_s10  ;;  %s469_s11 = sphi %s493_s11, %s14_s11   ;;  %s465_s10 = sphi %s491_s10, %s594_s10   ;;  %s461_s9 = sphi %s489_s9, %s593_s9   ;;  %s457_s8 = sphi %s487_s8, %s592_s8   ;;  %s453_s7 = sphi %s485_s7, %s591_s7   ;;  %s449_s6 = sphi %s483_s6, %s590_s6  }
   0x5   : > { %p28_p0 = scmp.ge.s32.totalorder %s26_s13, 2  ;;  %s35_s14 = sadd.s32 1, %s457_s8 }
   0x6   : > { %p42_p1 = scmp.ne.s32.totalorder %s457_s8, %s453_s7  ;;  %p43_p2 = scmp.eq.s32.totalorder %s469_s11, 0 }
   0x7   : > { %s596_s13 = smov (%p28_p0, %s26_s13), 0  ;;  %p48_p4 = scmp.ne.s32.totalorder %s453_s7, %s449_s6 }
   0x8   : > { %p519_p3 = por %p43_p2, %p42_p1  ;;  %s30_s16 = ssub.s32 %s465_s10, %s596_s13 }
   0x9   : > { %p49_p5 = scmp.eq.s32.totalorder %s318_s12, 0  ;;  %p33_p6 = scmp.eq.s32.totalorder %s30_s16, 0 }
   0xa   : > { %p336_p8 = scmp.lt.s32.totalorder %s469_s11, 2  ;;  %s98_s19 = sand.u32 1, %s457_s8  }
   0xb   : > { %p526_p7 = por %p49_p5, %p48_p4  ;;  %s329_s20 = sshll.u32 %s465_s10, 3 }
   0xc   : > { %s532_s18 = scalar_select %p33_p6, %s457_s8, %s35_s14  }
   0xd   : > { %s322_s21 = sshll.u32 %s98_s19, 3  ;;  %s109_s24 = scalar_lea.hbm %s584_s0, %s329_s20 }
   0xe   : > { %s111_s25 = sshll.u32 %s109_s24, 4  ;;  %s102_s26 = scalar_lea.vmem [#allocation3], %s322_s21  ;;  %s112_s25 = int_to_ptr.hbm [resolvable:$true] %s111_s25 }
   0xf   : > { %s113_s27 = sshll.u32 %s102_s26, 4  ;;  %p333_p9 = pnand %p336_p8, %p519_p3  ;;  %s114_s27 = int_to_ptr.vmem [resolvable:$true] %s113_s27 }
  0x10   : > { %p325_p10 = scmp.ge.s32.totalorder %s469_s11, 1  ;;  %p118_p11 = scmp.lt.s32.totalorder %s469_s11, 3 }
  0x11   : > { %s99_s28 = scalar_lea.sflag [#allocation4], %s98_s19 }
  0x12   : > { %335 = dma.hbm_to_vmem [thread:$0]  (!%p333_p9), %s112_s25, 128, %s114_s27, %s99_s28  }
  0x13   : > { %p119_p12 = pnand %p325_p10, %p118_p11 }
  0x14   : > { %s124_s29 = sand.u32 (!%p119_p12), 1, %s453_s7  }
  0x15   : > { %122 = sbr.rel (%p119_p12) target bundleno = 217 (0xd9), region = 24  ;;  %s326_s30 = sshll.u32 (!%p119_p12), %s124_s29, 3 }
  0x16   : > { %s125_s2 = scalar_lea.sflag (!%p119_p12), [#allocation4], %s124_s29  ;;  %s128_s3 = scalar_lea.vmem (!%p119_p12), [#allocation3], %s326_s30 }
  0x1a   : > { %444 = dma.done.wait (%p526_p7), %s125_s2, 128  }
  0x1b   : > { %446 = vsyncadd (%p526_p7), %s125_s2, 4294967168  ;;  %v154_v0 = vlaneseq  ;;  %v471_v1 = vmov 4.0   ;;  %v472_v3 = vmov 0.0   ;;  %v159_v5 = vld [vmem:[%s128_s3] sm:$0xff]  ;;  %vm166_vm1 = vcmask 1043456   ;;  %p147_p13 = scmp.lt.s32.totalorder %s461_s9, 1 }
  0x1c   : > { %387 = vrcp.f32 %v471_v1  ;;  %161 = vst [vmem:[#allocation1] ss:$2 sm:$0xff] %v159_v5  ;;  %vm223_vm3 = vcmask 1040384   ;;  %vm246_vm4 = vcmask 0  }
  0x1d   : > { %vm548_vm0 = vcmp.lt.s32.totalorder %v154_v0, 256  ;;  %s598_s9 = smov (!%p147_p13, %s461_s9), 1 }
  0x1e   : > { %158 = vst.msk [vmem:[#allocation2] sm:$0x3] %vm548_vm0, %v472_v3  ;;  %s149_s6 = scalar_lea.vmem %s585_s1, %s598_s9 }
  0x22   : > { %v388_v4 = vpop.eup %387 }
  0x23   : > { %v182_v6 = vmul.f32 4.0, %v388_v4  ;;  %v162_v8 = vld.sshfl [vmem:[#allocation1] sm:$0xff pattern:$0x75316420]  ;;  %vm186_vm2 = vweird.f32 %v388_v4 }
  0x24   : > { %v163_v9 = vld.sshfl [vmem:[#allocation1 + $0x8] sm:$0xff pattern:$0x75316420]  ;;  %v167_v10 = vsel %vm166_vm1, %v162_v8, 0.0 }
  0x25   : > { %v183_v7 = vsub.f32 1.0, %v182_v6  ;;  %v174_v11 = vsel %vm166_vm1, %v163_v9, 0.0  ;;  %v168_v12 = vrot.slane %v167_v10, 4  ;;  %v219_v51 = vld [vmem:[#allocation2] sm:$0x3] }
  0x26   : > { %v175_v13 = vrot.slane %v174_v11, 4 }
  0x27   : > { %v184_v14 = vmul.f32 %v388_v4, %v183_v7  ;;  %v169_v15 = vadd.f32 %v168_v12, %v167_v10 }
  0x28   : > { %v176_v16 = vadd.f32 %v175_v13, %v174_v11 }
  0x29   : > { %v170_v17 = vrot.slane %v169_v15, 2  ;;  %v185_v19 = vadd.f32 %v388_v4, %v184_v14 }
  0x2a   : > { %v177_v18 = vrot.slane %v176_v16, 2 }
  0x2b   : > { %v171_v20 = vadd.f32 %v170_v17, %v169_v15  ;;  %v187_v24 = vsel %vm186_vm2, %v388_v4, %v185_v19 }
  0x2c   : > { %v178_v21 = vadd.f32 %v177_v18, %v176_v16 }
  0x2d   : > { %v172_v22 = vrot.slane %v171_v20, 1 }
  0x2e   : > { %v179_v23 = vrot.slane %v178_v21, 1 }
  0x2f   : > { %v173_v25 = vadd.f32 %v172_v22, %v171_v20 }
  0x30   : > { %v180_v26 = vadd.f32 %v179_v23, %v178_v21 }
  0x31   : > { %v188_v27 = vmul.f32 %v187_v24, %v173_v25 }
  0x32   : > { %v189_v28 = vmul.f32 %v187_v24, %v180_v26 }
  0x34   : > { %v192_v29 = vrot.slane %v189_v28, 4 }
  0x36   : > { %v193_v30 = vsel %vm166_vm1, %v188_v27, %v192_v29 }
  0x37   : > { %v195_v31 = vsub.f32 %v159_v5, %v193_v30 }
  0x39   : > { %v196_v32 = vmul.f32 %v195_v31, %v195_v31 }
  0x3b   : > { %198 = vst [vmem:[#allocation1] ss:$2 sm:$0xff] %v196_v32 }
  0x42   : > { %v199_v33 = vld.sshfl [vmem:[#allocation1] sm:$0xff pattern:$0x75316420]  ;;  %v200_v34 = vld.sshfl [vmem:[#allocation1 + $0x8] sm:$0xff pattern:$0x75316420] }
  0x43   : > { %v203_v35 = vsel %vm166_vm1, %v199_v33, 0.0  ;;  %v210_v36 = vsel %vm166_vm1, %v200_v34, 0.0 }
  0x44   : > { %v204_v37 = vrot.slane %v203_v35, 4  ;;  %v211_v38 = vrot.slane %v210_v36, 4 }
  0x46   : > { %v205_v39 = vadd.f32 %v204_v37, %v203_v35  ;;  %v212_v40 = vadd.f32 %v211_v38, %v210_v36 }
  0x48   : > { %v206_v41 = vrot.slane %v205_v39, 2  ;;  %v213_v42 = vrot.slane %v212_v40, 2 }
  0x4a   : > { %v207_v43 = vadd.f32 %v206_v41, %v205_v39  ;;  %v214_v44 = vadd.f32 %v213_v42, %v212_v40 }
  0x4c   : > { %v208_v45 = vrot.slane %v207_v43, 1  ;;  %v215_v46 = vrot.slane %v214_v44, 1 }
  0x4e   : > { %v209_v47 = vadd.f32 %v208_v45, %v207_v43  ;;  %v216_v48 = vadd.f32 %v215_v46, %v214_v44 }
  0x50   : > { %v217_v49 = vmul.f32 %v209_v47, %v187_v24  ;;  %v218_v50 = vmul.f32 %v216_v48, %v187_v24 }
  0x52   : > { %v222_v52 = vrot.slane %v218_v50, 7 }
  0x54   : > { %v224_v53 = vsel %vm223_vm3, %v217_v49, %v222_v52 }
  0x55   : > { %v226_v54 = vadd.f32 %v224_v53, %v219_v51 }
  0x57   : > { %231 = vst.msk [vmem:[#allocation2] sm:$0x3] %vm548_vm0, %v226_v54 }
  0x5e   : > { %v235_v55 = vld [vmem:[#allocation2] sm:$0x3] }
  0x5f   : > { %v237_v56 = vperm.slane %v235_v55, 0  ;;  %v238_v57 = vperm.slane %v235_v55, 1 }
  0x61   : > { %v241_v58 = vsel %vm223_vm3, %v237_v56, 0.0  ;;  %v242_v59 = vsel %vm223_vm3, %v238_v57, 0.0 }
  0x62   : > { %v243_v60 = vadd.f32 %v242_v59, %v241_v58 }
  0x64   : > { %244 = vadd.xlane.f32.xlu0 %v243_v60 }
  0xd7   : > { %v245_v61 = vpop.xlane.xlu0 %244 }
  0xd8   : > { %247 = vst.msk [vmem:[%s149_s6] sm:$0x1] %vm246_vm4, %v245_v61 }
  0xd9 PF: > { %s14_s11 = sadd.s32 1, %s469_s11   ;;  %s590_s6 = smov %s453_s7 }
  0xda   : > { %p11_p0 = scmp.ge.s32.totalorder %s14_s11, 4   ;;  %s591_s7 = smov %s457_s8 }
  0xdb   : > { %s592_s8 = smov %s532_s18  ;;  %s593_s9 = smov %s465_s10 }
  0xdc   : > { %s594_s10 = smov %s596_s13  ;;  %13 = sbr.rel (!%p11_p0) target bundleno = 4 (0x4), region = 72 }
  0xe1   :  { %265 = vsyncpa [#allocation4], 1 }
  0xe2   :  { %267 = vsyncpa [#allocation4 + $0x1], 1 }

</bundles_post_ra>
